<compile_context>
chip_gen: v5e
topology: v5e:2x2
jax: 0.10.0
libtpu: 0.0.40
codegen_flags: <defaults>
</compile_context>

<pallas_src>
import jax
import jax.numpy as jnp
from jax.experimental import pallas as pl
from jax.experimental.pallas import tpu as pltpu


# ----------------------------- Pallas kernels ------------------------------

def _add_bias_rows_kernel(x_ref, b_ref, o_ref):
    # x: (TR, TL), b: (TR, 1) -> broadcast per-row bias across lanes.
    o_ref[...] = x_ref[...] + b_ref[...]


def _add_bias_cols_kernel(x_ref, b_ref, o_ref):
    # x: (TN, TC), b: (1, TC) -> broadcast per-column bias across sublanes.
    o_ref[...] = x_ref[...] + b_ref[...]


# ------------------------------- helpers ------------------------------------

def _pick_block(dim, preferred, align):
    """Largest candidate that evenly divides `dim` and is `align`-aligned.

    Falls back to the full dim (always a legal TPU block shape). Candidates
    are sized so 2x double-buffered (x + out) blocks stay far below the
    scoped-VMEM default on v5e/v6e/v7x.
    """
    for b in preferred:
        if b <= dim and dim % b == 0 and b % align == 0:
            return b
    return dim


_ROW_TILES = (256, 128, 64, 32, 16, 8)          # sublane-axis candidates
_LANE_TILES = (2048, 1024, 512, 256, 128)       # lane-axis candidates


# ------------------------------- wrapper -----------------------------------

class AddBias:
    """JAX/Pallas port of the PyTorch AddBias module."""

    def __init__(self, bias):
        b = jnp.asarray(bias)
        # Hoisted bias prep (matches torch's (C,1) parameter + its transposes).
        self._bias_col = b.reshape(-1, 1)   # (C, 1)
        self._bias_row = b.reshape(1, -1)   # (1, C)

    def __call__(self, x):
        c = self._bias_col.shape[0]

        if x.ndim == 2:
            # (N, C) + (1, C)
            n = x.shape[0]
            assert x.shape[1] == c
            tn = _pick_block(n, _ROW_TILES, 8)
            tc = _pick_block(c, _LANE_TILES, 128)
            grid = (n // tn, c // tc)
            bias = self._bias_row.astype(x.dtype)
            return pl.pallas_call(
                _add_bias_cols_kernel,
                out_shape=jax.ShapeDtypeStruct((n, c), x.dtype),
                grid=grid,
                in_specs=[
                    pl.BlockSpec((tn, tc), lambda i, j: (i, j)),
                    pl.BlockSpec((1, tc), lambda i, j: (0, j)),
                ],
                out_specs=pl.BlockSpec((tn, tc), lambda i, j: (i, j)),
                compiler_params=pltpu.CompilerParams(
                    dimension_semantics=("parallel", "parallel")),
            )(x, bias)

        assert x.ndim == 4, "AddBias expects 2-D or 4-D input"
        n, cc, h, w = x.shape
        assert cc == c

        # Flatten NCHW -> (N*C, H*W): spatial axis becomes the lane axis
        # (lane-dense stores), channel/batch fill the sublane axis even for
        # tiny C. Per-row bias is the channel bias tiled over the batch
        # (N*C*4 bytes of glue — negligible).
        rows, hw = n * c, h * w
        x2 = x.reshape(rows, hw)
        bias = jnp.tile(self._bias_col.astype(x.dtype), (n, 1))  # (N*C, 1)

        tr = _pick_block(rows, _ROW_TILES, 8)
        tl = _pick_block(hw, _LANE_TILES, 128)
        grid = (rows // tr, hw // tl)

        out2 = pl.pallas_call(
            _add_bias_rows_kernel,
            out_shape=jax.ShapeDtypeStruct((rows, hw), x.dtype),
            grid=grid,
            in_specs=[
                pl.BlockSpec((tr, tl), lambda i, j: (i, j)),
                # Bias block index only depends on i -> not re-DMA'd while the
                # inner (lane) axis advances.
                pl.BlockSpec((tr, 1), lambda i, j: (i, 0)),
            ],
            out_specs=pl.BlockSpec((tr, tl), lambda i, j: (i, j)),
            compiler_params=pltpu.CompilerParams(
                dimension_semantics=("parallel", "parallel")),
        )(x2, bias)
        return out2.reshape(n, c, h, w)


# --------------------------------- demo ------------------------------------

if __name__ == "__main__":
    key = jax.random.PRNGKey(0)
    k_bias, k_x4, k_x2 = jax.random.split(key, 3)

    C = 4
    bias = jax.random.normal(k_bias, (C,), dtype=jnp.float32)
    module = AddBias(bias)

    # 4-D (NCHW) path
    x4 = jax.random.normal(k_x4, (2, C, 16, 16), dtype=jnp.float32)
    out4 = jax.block_until_ready(module(x4))
    ref4 = x4 + bias.reshape(1, C, 1, 1)

    # 2-D path
    x2 = jax.random.normal(k_x2, (2, C), dtype=jnp.float32)
    out2 = jax.block_until_ready(module(x2))
    ref2 = x2 + bias.reshape(1, C)

    assert out4.shape == x4.shape and out4.dtype == x4.dtype
    assert out2.shape == x2.shape and out2.dtype == x2.dtype
    assert jnp.allclose(out4, ref4, atol=1e-6, rtol=1e-6)
    assert jnp.allclose(out2, ref2, atol=1e-6, rtol=1e-6)

    print("KERNEL_OK")
</pallas_src>

<mosaic_0001>
module attributes {stable_mosaic.version = 11 : i64} {
  func.func @_add_bias_rows_kernel(%arg0: i32, %arg1: i32, %arg2: memref<8x256xf32, #tpu.memory_space<vmem>>, %arg3: memref<8x1xf32, #tpu.memory_space<vmem>>, %arg4: memref<8x256xf32, #tpu.memory_space<vmem>>) attributes {dimension_semantics = [#tpu.dimension_semantics<parallel>, #tpu.dimension_semantics<parallel>], iteration_bounds = array<i64: 1, 1>, scalar_prefetch = 0 : i64, scratch_operands = 0 : i64, tpu.core_type = #tpu.core_type<tc>, window_params = [{transform_indices = @transform_0, window_bounds = array<i64: 8, 256>}, {transform_indices = @transform_1, window_bounds = array<i64: 8, 1>}, {transform_indices = @transform_2, window_bounds = array<i64: 8, 256>}]} {
    %c0 = arith.constant 0 : index
    %c0_0 = arith.constant 0 : index
    %0 = vector.load %arg2[%c0, %c0_0] : memref<8x256xf32, #tpu.memory_space<vmem>>, vector<8x256xf32>
    %c0_1 = arith.constant 0 : index
    %c0_2 = arith.constant 0 : index
    %1 = vector.load %arg3[%c0_1, %c0_2] : memref<8x1xf32, #tpu.memory_space<vmem>>, vector<8x1xf32>
    %2 = vector.broadcast %1 : vector<8x1xf32> to vector<8x256xf32>
    %3 = arith.addf %0, %2 : vector<8x256xf32>
    %c0_3 = arith.constant 0 : index
    %c0_4 = arith.constant 0 : index
    %4 = vector.load %arg4[%c0_3, %c0_4] : memref<8x256xf32, #tpu.memory_space<vmem>>, vector<8x256xf32>
    tpu.vector_store %arg4[%c0_3, %c0_4], %3 {strides = array<i32>} : memref<8x256xf32, #tpu.memory_space<vmem>>, vector<8x256xf32>,
    return
  }
  func.func @transform_0(%arg0: i32, %arg1: i32) -> (i32, i32) {
    %c0_i32 = arith.constant 0 : i32
    return %arg0, %arg1 : i32, i32
  }
  func.func @transform_1(%arg0: i32, %arg1: i32) -> (i32, i32) {
    %c0_i32 = arith.constant 0 : i32
    %c0_i32_0 = arith.constant 0 : i32
    return %arg0, %c0_i32 : i32, i32
  }
  func.func @transform_2(%arg0: i32, %arg1: i32) -> (i32, i32) {
    %c0_i32 = arith.constant 0 : i32
    return %arg0, %arg1 : i32, i32
  }
}

</mosaic_0001>

<bundles_post_ra>
// kernel: tpu_custom_call.1
= control target key start
LH: loop header
LB: loop body
LE: loop exit
PB: predicated region body
PF: predicated region fallthrough
CT: control target
= control target key end

     0   :  { %7 = vsyncpa [#allocation3], 0  ;;  %s138_s0 = inlined_call_operand.hbm [shape: f32[8,256], index: 0, kind: input, shape index: {}]   ;;  %s139_s1 = inlined_call_operand.vmem [shape: f32[8,1], index: 1, kind: input, shape index: {}]   ;;  %s140_s2 = inlined_call_operand.hbm [shape: f32[8,256], index: 2, kind: output, shape index: {}]  }
   0x1   :  { %8 = vsyncpa [#allocation4], 0  ;;  %s14_s11 = sshll.u32 %s138_s0, 4  ;;  %s111_s12 = smov [#allocation2]   ;;  %s15_s11 = int_to_ptr.hbm [resolvable:$true] %s14_s11 }
   0x2   :  { %s16_s13 = sshll.u32 %s111_s12, 4  ;;  %s17_s13 = int_to_ptr.vmem [resolvable:$true] %s16_s13 }
   0x3   :  { %19 = dma.hbm_to_vmem [thread:$0]  %s15_s11, 256, %s17_s13, [#allocation3]  }
   0x4   :  { %107 = dma.done.wait [#allocation3], 256  }
   0x5   :  { %108 = vsyncadd [#allocation3], 4294967040  ;;  %v112_v0 = vmov 0   ;;  %v28_v1 = vld [vmem:[%s139_s1] sm:$0xff]  ;;  %v27_v3 = vld [vmem:[#allocation2 + $0x8] sm:$0xff]  ;;  %s113_s16 = smov [#allocation5]  }
   0x6   :  { %58 = vset.pattern.permute.xlu0 %v112_v0  ;;  %v26_v2 = vld [vmem:[#allocation2] sm:$0xff]  ;;  %s43_s17 = sshll.u32 %s113_s16, 4  ;;  %s45_s19 = sshll.u32 %s140_s2, 4  ;;  %s44_s17 = int_to_ptr.vmem [resolvable:$true] %s43_s17  ;;  %s46_s19 = int_to_ptr.hbm [resolvable:$true] %s45_s19 }
   0x7   :  { %31 = vperm.xlu0 %58, %v28_v1  }
  0x79   :  { %v32_v4 = vpop.permute.xlu0 %31 }
  0x7a   :  { %v34_v5 = vadd.f32 %v32_v4, %v26_v2  ;;  %v35_v6 = vadd.f32 %v32_v4, %v27_v3 }
  0x7c   :  { %36 = vst [vmem:[#allocation5] sm:$0xff] %v34_v5 }
  0x7d   :  { %37 = vst [vmem:[#allocation5 + $0x8] sm:$0xff] %v35_v6 }
  0x7e   :  { %48 = dma.vmem_to_hbm [thread:$0]  %s44_s17, 256, %s46_s19, [#allocation4]  }
  0x7f   :  { %109 = dma.done.wait [#allocation4], 256  }
  0x80   :  { %110 = vsyncadd [#allocation4], 4294967040 }
  0x81   :  { %53 = vsyncpa [#allocation3], 1 }
  0x82   :  { %54 = vsyncpa [#allocation4], 1 }

</bundles_post_ra>
